<compile_context>
chip_gen: v6e
topology: v6e:2x2x1
jax: 0.10.0
libtpu: 0.0.40
codegen_flags: <defaults>
</compile_context>

<pallas_src>
import jax
import jax.numpy as jnp
from jax.experimental import pallas as pl
from jax.experimental.pallas import tpu as pltpu

# ---------------- model dims (small, consistent with the module) -------------
B = 2                         # batch of image features
VIS_DIM = 32                  # clip_model.visual.output_dim
HID = VIS_DIM // 16           # meta_net hidden dim (=2)
CTX_DIM = 32                  # clip_model.ln_final.weight.shape[0]
N_CTX = 8                     # CFG['COCOOP']['prompt_learner']['n_ctx']
N_CLS = 3                     # number of classnames
SEQ_LEN = 16                  # total tokenized prompt length (prefix 1 + n_ctx + suffix)
N_SFX = SEQ_LEN - 1 - N_CTX   # suffix length (=7)
ROW = SEQ_LEN * CTX_DIM       # 512 -> lane-dense flattened (seq, dim) row


def prompt_learner_kernel(x_ref, w1_ref, w2_ref, tmpl_ref, out_ref):
    # x_ref:    (B, VIS_DIM+1)          image features with trailing 1 (b1 fold)
    # w1_ref:   (VIS_DIM+1, HID)        linear1 weight with b1 appended as last row
    # w2_ref:   (HID, CTX_DIM)          linear2 weight (b2 folded into template)
    # tmpl_ref: (N_CLS, ROW)            [prefix | ctx+b2 | suffix] per class, flat
    # out_ref:  (B, N_CLS, ROW)

    # --- meta_net MLP: Linear -> ReLU -> Linear (batched over B) --------------
    h = jnp.dot(x_ref[...], w1_ref[...], preferred_element_type=jnp.float32)   # (B, HID)
    h = jnp.maximum(h, 0.0)
    bias = jnp.dot(h, w2_ref[...], preferred_element_type=jnp.float32)         # (B, CTX_DIM)

    # --- per-batch addend row: 0 over prefix/suffix lanes, bias over ctx slots
    b_dim = x_ref.shape[0]
    zeros_pre = jnp.zeros((b_dim, CTX_DIM), jnp.float32)
    zeros_suf = jnp.zeros((b_dim, N_SFX * CTX_DIM), jnp.float32)
    addend = jnp.concatenate([zeros_pre] + [bias] * N_CTX + [zeros_suf],
                             axis=-1)                                           # (B, ROW)

    # --- prompts[b, c, :] = template[c, :] + addend[b, :]  (single dense store)
    out_ref[...] = tmpl_ref[...][None, :, :] + addend[:, None, :]


@jax.jit
def prompt_learner_forward(im_features, w1, b1, w2, b2, ctx, prefix, suffix):
    """Returns prompts of shape (B, N_CLS, SEQ_LEN, CTX_DIM)."""
    batch = im_features.shape[0]

    # Fold b1 into w1 via ones-augmentation of the input.
    x_aug = jnp.concatenate(
        [im_features, jnp.ones((batch, 1), im_features.dtype)], axis=1)         # (B, VIS+1)
    w1_aug = jnp.concatenate([w1, b1], axis=0)                                  # (VIS+1, HID)

    # Fold b2 (batch-invariant) into the context vectors.
    ctx_eff = ctx + b2                                                          # (N_CTX, D)

    # Batch-invariant, lane-dense template: [prefix | ctx+b2 | suffix] per class.
    tmpl = jnp.concatenate(
        [prefix,
         jnp.broadcast_to(ctx_eff[None], (N_CLS, N_CTX, CTX_DIM)),
         suffix],
        axis=1).reshape(N_CLS, ROW)                                             # (N_CLS, 512)

    out_flat = pl.pallas_call(
        prompt_learner_kernel,
        out_shape=jax.ShapeDtypeStruct((batch, N_CLS, ROW), jnp.float32),
        in_specs=[
            pl.BlockSpec(memory_space=pltpu.MemorySpace.VMEM),   # x_aug
            pl.BlockSpec(memory_space=pltpu.MemorySpace.VMEM),   # w1_aug
            pl.BlockSpec(memory_space=pltpu.MemorySpace.VMEM),   # w2
            pl.BlockSpec(memory_space=pltpu.MemorySpace.VMEM),   # template
        ],
        out_specs=pl.BlockSpec(memory_space=pltpu.MemorySpace.VMEM),
    )(x_aug, w1_aug, w2, tmpl)

    return out_flat.reshape(batch, N_CLS, SEQ_LEN, CTX_DIM)


def reference_forward(im_features, w1, b1, w2, b2, ctx, prefix, suffix):
    """Pure-JAX reference matching PromptLearner.forward (eval mode)."""
    h = jnp.maximum(im_features @ w1 + b1, 0.0)
    bias = h @ w2 + b2                                           # (B, CTX_DIM)
    ctx_shifted = ctx[None, :, :] + bias[:, None, :]             # (B, N_CTX, D)
    ctx_b = jnp.broadcast_to(ctx_shifted[:, None, :, :], (B, N_CLS, N_CTX, CTX_DIM))
    prefix_b = jnp.broadcast_to(prefix[None], (B, N_CLS, 1, CTX_DIM))
    suffix_b = jnp.broadcast_to(suffix[None], (B, N_CLS, N_SFX, CTX_DIM))
    return jnp.concatenate([prefix_b, ctx_b, suffix_b], axis=2)


if __name__ == "__main__":
    key = jax.random.PRNGKey(0)
    ks = jax.random.split(key, 8)

    # deterministic synthetic parameters (shapes follow PromptLearner.__init__)
    im_features = jax.random.normal(ks[0], (B, VIS_DIM), jnp.float32)
    # ctx_vectors ~ N(0, 0.02)
    ctx = 0.02 * jax.random.normal(ks[1], (N_CTX, CTX_DIM), jnp.float32)
    # meta_net: Linear(vis_dim, vis_dim//16) -> ReLU -> Linear(vis_dim//16, ctx_dim)
    w1 = jax.random.normal(ks[2], (VIS_DIM, HID), jnp.float32) / jnp.sqrt(VIS_DIM)
    b1 = 0.01 * jax.random.normal(ks[3], (1, HID), jnp.float32)
    w2 = jax.random.normal(ks[4], (HID, CTX_DIM), jnp.float32) / jnp.sqrt(HID)
    b2 = 0.01 * jax.random.normal(ks[5], (1, CTX_DIM), jnp.float32)
    # frozen token_prefix / token_suffix buffers (stand-ins for CLIP token embeddings)
    prefix = jax.random.normal(ks[6], (N_CLS, 1, CTX_DIM), jnp.float32)
    suffix = jax.random.normal(ks[7], (N_CLS, N_SFX, CTX_DIM), jnp.float32)

    # TODO(synk): PromptEnsemble (training-time CPU-side prompt history / Gaussian
    # weighting) is stateful host logic and is not part of the TPU kernel; this
    # implements the eval-mode forward path.

    prompts = prompt_learner_forward(im_features, w1, b1, w2, b2, ctx, prefix, suffix)
    prompts = jax.block_until_ready(prompts)

    ref = reference_forward(im_features, w1, b1, w2, b2, ctx, prefix, suffix)
    assert prompts.shape == (B, N_CLS, SEQ_LEN, CTX_DIM)
    assert jnp.allclose(prompts, ref, atol=1e-5, rtol=1e-5)

    print("KERNEL_OK")
</pallas_src>

<mosaic_0001>
module attributes {stable_mosaic.version = 11 : i64} {
  func.func @prompt_learner_kernel(%arg0: memref<2x33xf32, #tpu.memory_space<vmem>>, %arg1: memref<33x2xf32, #tpu.memory_space<vmem>>, %arg2: memref<2x32xf32, #tpu.memory_space<vmem>>, %arg3: memref<3x512xf32, #tpu.memory_space<vmem>>, %arg4: memref<2x3x512xf32, #tpu.memory_space<vmem>>) attributes {dimension_semantics = [], scalar_prefetch = 0 : i64, scratch_operands = 0 : i64, tpu.core_type = #tpu.core_type<tc>} {
    %c0 = arith.constant 0 : index
    %c0_0 = arith.constant 0 : index
    %0 = vector.load %arg0[%c0, %c0_0] : memref<2x33xf32, #tpu.memory_space<vmem>>, vector<2x33xf32>
    %c0_1 = arith.constant 0 : index
    %c0_2 = arith.constant 0 : index
    %1 = vector.load %arg1[%c0_1, %c0_2] : memref<33x2xf32, #tpu.memory_space<vmem>>, vector<33x2xf32>
    %cst = arith.constant dense<0.000000e+00> : vector<2x2xf32>
    %2 = tpu.matmul %0, %1, %cst {dimension_numbers = #tpu.dot_dimension_numbers<[1], [0], [0], [1], [0, 0, 1, 1], [], []>} : vector<2x33xf32>, vector<33x2xf32>, vector<2x2xf32> -> vector<2x2xf32>
    %cst_3 = arith.constant 0.000000e+00 : f32
    %3 = vector.broadcast %cst_3 : f32 to vector<2x2xf32>
    %4 = arith.maximumf %2, %3 : vector<2x2xf32>
    %c0_4 = arith.constant 0 : index
    %c0_5 = arith.constant 0 : index
    %5 = vector.load %arg2[%c0_4, %c0_5] : memref<2x32xf32, #tpu.memory_space<vmem>>, vector<2x32xf32>
    %cst_6 = arith.constant dense<0.000000e+00> : vector<2x32xf32>
    %6 = tpu.matmul %4, %5, %cst_6 {dimension_numbers = #tpu.dot_dimension_numbers<[1], [0], [0], [1], [0, 0, 1, 1], [], []>} : vector<2x2xf32>, vector<2x32xf32>, vector<2x32xf32> -> vector<2x32xf32>
    %cst_7 = arith.constant 0.000000e+00 : f32
    %7 = vector.broadcast %cst_7 : f32 to vector<2x32xf32>
    %cst_8 = arith.constant 0.000000e+00 : f32
    %8 = vector.broadcast %cst_8 : f32 to vector<2x224xf32>
    %9 = tpu.concatenate %7, %6, %6, %6, %6, %6, %6, %6, %6, %8 in 1 : vector<2x32xf32>, vector<2x32xf32>, vector<2x32xf32>, vector<2x32xf32>, vector<2x32xf32>, vector<2x32xf32>, vector<2x32xf32>, vector<2x32xf32>, vector<2x32xf32>, vector<2x224xf32> -> vector<2x512xf32>
    %c0_9 = arith.constant 0 : index
    %c0_10 = arith.constant 0 : index
    %10 = vector.load %arg3[%c0_9, %c0_10] : memref<3x512xf32, #tpu.memory_space<vmem>>, vector<3x512xf32>
    %11 = vector.shape_cast %10 : vector<3x512xf32> to vector<1x3x512xf32>
    %12 = vector.shape_cast %9 : vector<2x512xf32> to vector<2x1x512xf32>
    %13 = vector.broadcast %11 : vector<1x3x512xf32> to vector<2x3x512xf32>
    %14 = vector.broadcast %12 : vector<2x1x512xf32> to vector<2x3x512xf32>
    %15 = arith.addf %13, %14 : vector<2x3x512xf32>
    %c0_11 = arith.constant 0 : index
    %c0_12 = arith.constant 0 : index
    %c0_13 = arith.constant 0 : index
    %16 = vector.load %arg4[%c0_11, %c0_12, %c0_13] : memref<2x3x512xf32, #tpu.memory_space<vmem>>, vector<2x3x512xf32>
    tpu.vector_store %arg4[%c0_11, %c0_12, %c0_13], %15 {strides = array<i32>} : memref<2x3x512xf32, #tpu.memory_space<vmem>>, vector<2x3x512xf32>,
    return
  }
}

</mosaic_0001>

<bundles_post_ra>
// kernel: prompt_learner_forward.1
= control target key start
LH: loop header
LB: loop body
LE: loop exit
PB: predicated region body
PF: predicated region fallthrough
CT: control target
= control target key end

     0   :  { %vm27_vm0 = vcmask 1040384   ;;  %v327_v0 = vmov 0.0   ;;  %vm328_vm1 = vmmov 0   ;;  %vm23_vm2 = vcmask 269312   ;;  %s330_s29 = smov 32   ;;  %s397_s1 = inlined_call_operand.vmem [shape: f32[33,2], index: 1, kind: input, shape index: {}]   ;;  %s398_s0 = inlined_call_operand.vmem [shape: f32[2,33], index: 0, kind: input, shape index: {}]   ;;  %s399_s2 = inlined_call_operand.vmem [shape: f32[2,32], index: 2, kind: input, shape index: {}]   ;;  %s400_s3 = inlined_call_operand.vmem [shape: f32[3,512], index: 3, kind: input, shape index: {}]   ;;  %s401_s4 = inlined_call_operand.vmem [shape: f32[2,3,512], index: 4, kind: output, shape index: {}]  }
   0x1   :  { %303 = vmatprep.subr.mxu0 %v327_v0  ;;  %v22_v1 = vld [vmem:[%s397_s1 + $0x20] sm:$0x1]  ;;  %v21_v2 = vld [vmem:[%s397_s1 + $0x18] sm:$0xff]  ;;  %313 = vmatprep.mubr.msk.f32.mxu0 %vm328_vm1, %v327_v0  ;;  %v20_v3 = vld [vmem:[%s397_s1 + $0x10] sm:$0xff]  ;;  %vm107_vm3 = vcmask 1041408   ;;  %vm103_vm4 = vcmask 15360   ;;  %v212_v15 = vlaneseq }
   0x2   :  { %304 = vmatpush3.msk.msra.mxu0 %vm27_vm0, %v22_v1  ;;  %316 = vmatprep.subr.mxu1 %v327_v0  ;;  %v19_v4 = vld [vmem:[%s397_s1 + $0x8] sm:$0xff]  ;;  %v18_v5 = vld [vmem:[%s397_s1] sm:$0xff]  ;;  %s329_s1 = smov 96   ;;  %v332_v13 = vmov 1966171168   ;;  %vm191_vm5 = vcmask 261120  }
   0x3   :  { %305 = vmatprep.subr.mxu0 %v327_v0  ;;  %318 = vmatprep.mubr.msk.f32.mxu1 %vm328_vm1, %v327_v0  ;;  %v17_v6 = vld [vmem:[%s398_s0] sm:$0x3]  ;;  %s331_s0 = smov 64   ;;  %v210_v14 = vunpack.c.l.s4 %v332_v13  ;;  %v213_v18 = vshrl.u32 %v212_v15, 7  ;;  %vm193_vm6 = vcmask 523264   ;;  %vm195_vm7 = vcmask 785408  }
   0x4   :  { %306 = vmatpush3.msra.mxu0 %v21_v2  ;;  %v102_v7 = vld [vmem:[%s399_s2] sm:$0x3]  ;;  %v202_v46 = vld [vmem:[%s400_s3 + $0x8] sm:$0x77] }
   0x5   :  { %307 = vmatprep.subr.mxu0 %v327_v0  ;;  %317 = vmatpush3.msk.msra.mxu1 %vm107_vm3, %v102_v7  ;;  %v211_v17 = vunpack.c.0.s8 %v210_v14  ;;  %v241_v33 = vsub.s32 0, %v213_v18  ;;  %v245_v34 = vsub.s32 1, %v213_v18  ;;  %v249_v35 = vsub.s32 2, %v213_v18  ;;  %v201_v45 = vld [vmem:[%s400_s3] sm:$0x77] }
   0x6   :  { %308 = vmatpush3.msra.mxu0 %v20_v3  ;;  %v253_v36 = vsub.s32 3, %v213_v18 }
   0x7   :  { %309 = vmatprep.subr.mxu0 %v327_v0  ;;  %v214_v24 = vsub.s32 %v211_v17, %v213_v18 }
   0x8   :  { %310 = vmatpush3.msra.mxu0 %v19_v4 }
   0x9   :  { %311 = vmatprep.subr.mxu0 %v327_v0 }
   0xa   :  { %312 = vmatpush3.msra.mxu0 %v18_v5 }
   0xb   :  { %314 = vmatmul.mubr.msk.f32.vlgmr.msra.gmra.mxu0 %vm23_vm2, %v17_v6 }
  0xcb   :  { %v97_v8 = vpop.f32.mrf.mxu0 }
  0xcc   :  { %v101_v9 = vmax.f32 %v97_v8, 0.0 }
  0xcd   :  { %v315_v10 = vpop.f32.mrf.mxu0 }
  0xce   :  { %319 = vmatmul.mubr.msk.f32.vlgmr.msra.gmra.mxu1 %vm103_vm4, %v101_v9 }
 0x18e   :  { %v177_v11 = vpop.f32.mrf.mxu1 }
 0x18f   :  { %188 = vrot.lane.b32.xlu1 %v177_v11, %s329_s1  ;;  %182 = vrot.lane.b32.xlu0 %v177_v11, %s330_s29  ;;  %v200_v19 = vsel %vm191_vm5, %v177_v11, 0.0 }
 0x190   :  { %v320_v12 = vpop.f32.mrf.mxu1  ;;  %v208_v25 = vcombine.low %v200_v19, %v327_v0 }
 0x192   :  { %v222_v31 = vrot.slane %v208_v25, %v214_v24 }
 0x193   :  { %185 = vrot.lane.b32.xlu0 %v177_v11, %s331_s0 }
 0x201   :  { %v183_v16 = vpop.permute.xlu0 %182  ;;  %v189_v23 = vpop.permute.xlu1 %188 }
 0x202   :  { %v192_v20 = vsel %vm191_vm5, 0.0, %v183_v16  ;;  %v197_v21 = vsel %vm191_vm5, %v177_v11, %v183_v16 }
 0x205   :  { %v186_v22 = vpop.permute.xlu0 %185 }
 0x206   :  { %v194_v26 = vsel %vm193_vm6, %v192_v20, %v186_v22  ;;  %v198_v27 = vsel %vm193_vm6, %v197_v21, %v186_v22 }
 0x207   :  { %v196_v28 = vsel %vm195_vm7, %v194_v26, %v189_v23  ;;  %v199_v29 = vsel %vm195_vm7, %v198_v27, %v189_v23 }
 0x208   :  { %v207_v30 = vcombine.low %v196_v28, %v199_v29 }
 0x20a   :  { %v215_v32 = vrot.slane %v207_v30, %v214_v24 }
 0x20c   :  { %v223_v37 = vcombine.low %v215_v32, %v222_v31  ;;  %v224_v38 = vcombine.high %v215_v32, %v222_v31 }
 0x20e   :  { %v231_v39 = vrot.slane %v223_v37, %v214_v24  ;;  %v238_v40 = vrot.slane %v224_v38, %v214_v24 }
 0x210   :  { %v242_v41 = vrot.slane %v231_v39, %v241_v33  ;;  %v246_v42 = vrot.slane %v231_v39, %v245_v34  ;;  %v250_v43 = vrot.slane %v231_v39, %v249_v35  ;;  %v254_v44 = vrot.slane %v231_v39, %v253_v36 }
 0x211   :  { %v258_v47 = vrot.slane %v238_v40, %v241_v33  ;;  %v262_v48 = vrot.slane %v238_v40, %v245_v34  ;;  %v266_v49 = vrot.slane %v238_v40, %v249_v35  ;;  %v270_v50 = vrot.slane %v238_v40, %v253_v36 }
 0x212   :  { %v271_v51 = vcombine.low %v242_v41, %v246_v42  ;;  %v272_v52 = vcombine.low %v250_v43, %v254_v44 }
 0x213   :  { %v273_v53 = vcombine.low %v258_v47, %v262_v48  ;;  %v274_v54 = vcombine.low %v266_v49, %v270_v50 }
 0x214   :  { %v279_v55 = vadd.f32 %v271_v51, %v201_v45  ;;  %v280_v56 = vadd.f32 %v272_v52, %v202_v46 }
 0x215   :  { %v281_v57 = vadd.f32 %v273_v53, %v201_v45  ;;  %v282_v58 = vadd.f32 %v274_v54, %v202_v46 }
 0x216   :  { %283 = vst [vmem:[%s401_s4] sm:$0x77] %v279_v55  ;;  %284 = vst [vmem:[%s401_s4 + $0x8] sm:$0x77] %v280_v56 }
 0x217   :  { %285 = vst [vmem:[%s401_s4 + $0x10] sm:$0x77] %v281_v57  ;;  %286 = vst [vmem:[%s401_s4 + $0x18] sm:$0x77] %v282_v58 }

</bundles_post_ra>
